<compile_context>
chip_gen: v7x
topology: tpu7x:2x2x1
jax: 0.10.0
libtpu: 0.0.40
codegen_flags: <defaults>
</compile_context>

<pallas_src>
import functools
import math

import jax
import jax.numpy as jnp
from jax import lax
from jax.experimental import pallas as pl
from jax.experimental.pallas import tpu as pltpu


# ---------------------------------------------------------------------------
# Hardware-aware budgets
# ---------------------------------------------------------------------------
def _vmem_capacity_bytes():
    try:
        info_fn = getattr(pltpu, "get_tpu_info", None)
        if info_fn is not None:
            cap = getattr(info_fn(), "vmem_capacity_bytes", None)
            if cap:
                return int(cap)
    except Exception:
        pass
    return 128 * 1024 * 1024  # v5e / v6e default


_VMEM_CAP = _vmem_capacity_bytes()
# Scoped-VMEM limit handed to Mosaic (~75% of physical: 48 MiB on v7x, 96 MiB
# on v5e/v6e) and a smaller working-set budget used when sizing tiles so the
# compiler's softmax temporaries still fit.
_VMEM_LIMIT = int(min(_VMEM_CAP * 3 // 4, 100 * 1024 * 1024))
_TILE_BUDGET = int(min(_VMEM_CAP * 9 // 20, 48 * 1024 * 1024))


def _compiler_params(**kw):
    cls = getattr(pltpu, "CompilerParams", None) or getattr(pltpu, "TPUCompilerParams")
    return cls(**kw)


def _pick_tile(dim, target, align):
    """Largest block size <= target that divides `dim` and is a multiple of
    `align`, or the full dim.  Fails loudly instead of silently producing a
    VMEM-blowing full-dim block for large awkward sizes."""
    if dim <= target:
        return dim
    t = (target // align) * align
    while t >= align:
        if dim % t == 0:
            return t
        t -= align
    if dim > 4 * target:
        raise ValueError(
            f"no {align}-aligned tile <= {target} divides dim={dim}; "
            "pad the input to an (8,128)-friendly size")
    return dim


def _divisors_desc(n):
    return [d for d in range(n, 0, -1) if n % d == 0]


# ---------------------------------------------------------------------------
# Kernel 1: fused QKV projection  qkv = x @ W^T + b  (W in torch (out,in))
# writes heads-major (3*B*H, T, dh), leading dim ordered (proj, batch, head).
# ---------------------------------------------------------------------------
def _qkv_proj_kernel(x_ref, w_ref, b_ref, o_ref, acc_ref, *, tb, bsz, nheads, hdim):
    k = pl.program_id(2)

    @pl.when(k == 0)
    def _():
        acc_ref[...] = jnp.zeros_like(acc_ref)

    # Contract the last dims of x (tm, tk) and w (E, tk): the torch (out, in)
    # weight layout is consumed natively, no transpose materialized.
    acc_ref[...] += lax.dot_general(
        x_ref[...], w_ref[...],
        dimension_numbers=(((1,), (1,)), ((), ())),
        preferred_element_type=jnp.float32)

    @pl.when(k == pl.num_programs(2) - 1)
    def _():
        out = acc_ref[...] + b_ref[...].reshape(1, -1).astype(jnp.float32)  # (tm, E)
        # In-VMEM relayout from (t,b) rows x (h,d) cols to heads-major
        # (b,h,t,d): replaces the wrapper-side HBM transpose of the old code.
        out = out.reshape(tb, bsz, nheads, hdim).transpose(1, 2, 0, 3)
        o_ref[...] = out.reshape(o_ref.shape).astype(o_ref.dtype)


def qkv_projection(x, qkv_w, qkv_b3, tgt_len, bsz, num_heads, head_dim):
    """x: (T*B, E) rows ordered (t, b); qkv_w: (3E, E); qkv_b3: (3, H, dh).
    Returns (3*B*H, T, dh), leading dim ordered (proj, batch, head)."""
    m, e = x.shape
    tb = _pick_tile(tgt_len, max(8, 256 // max(1, bsz)), 8)
    tm = tb * bsz
    tk = _pick_tile(e, 1024 if _VMEM_CAP >= 96 * 1024 * 1024 else 512, 128)
    # Keep (E, tk) weight block + (tm, tk) x block + fp32 acc inside budget.
    while tk > 128 and (2 * (e * tk + tm * tk) + 3 * tm * e) * 4 > _TILE_BUDGET:
        nk = _pick_tile(e, tk // 2, 128)
        if nk >= tk:
            break
        tk = nk

    kernel = functools.partial(_qkv_proj_kernel, tb=tb, bsz=bsz,
                               nheads=num_heads, hdim=head_dim)
    return pl.pallas_call(
        kernel,
        out_shape=jax.ShapeDtypeStruct((3 * bsz * num_heads, tgt_len, head_dim),
                                       x.dtype),
        grid=(m // tm, 3, e // tk),
        in_specs=[
            pl.BlockSpec((tm, tk), lambda i, j, k: (i, k)),
            pl.BlockSpec((e, tk), lambda i, j, k: (j, k)),
            pl.BlockSpec((1, num_heads, head_dim), lambda i, j, k: (j, 0, 0)),
        ],
        out_specs=pl.BlockSpec((bsz * num_heads, tb, head_dim),
                               lambda i, j, k: (j, i, 0)),
        scratch_shapes=[pltpu.VMEM((tm, e), jnp.float32)],
        compiler_params=_compiler_params(
            dimension_semantics=("parallel", "parallel", "arbitrary"),
            vmem_limit_bytes=_VMEM_LIMIT),
    )(x, qkv_w, qkv_b3)


# ---------------------------------------------------------------------------
# Kernel 2: attention over one (batch, head-group, q-tile) step.
# K/V block indices do not depend on the (innermost) q-tile axis, so they stay
# VMEM-resident for the whole q sweep of a head group.
# ---------------------------------------------------------------------------
def _attn_kernel(q_ref, k_ref, v_ref, o_ref, *wm_refs, inv_num_heads):
    q = q_ref[...]          # (g, tq, dh) -- 1/sqrt(head_dim) folded into weights
    k = k_ref[...]          # (g, S,  dh)
    v = v_ref[...]          # (g, S,  dh)

    # Batched QK^T contracting the last dims -- no transpose materialized.
    s = jnp.einsum("gtd,gsd->gts", q, k, preferred_element_type=jnp.float32)

    # fp32 softmax (matches utils_softmax(dtype=float32)); exact 1/denom on the
    # small (g, tq, 1) tensor, multiply on the big one.
    m = jnp.max(s, axis=-1, keepdims=True)
    e = jnp.exp(s - m)
    denom = jnp.sum(e, axis=-1, keepdims=True)
    p = e * (1.0 / denom)

    ctx = jnp.einsum("gts,gsd->gtd", p.astype(v.dtype), v,
                     preferred_element_type=jnp.float32)        # (g, tq, dh)
    # Lane-dense (tq, g*dh) slab via in-VMEM relayout (no wrapper transpose).
    ctx = jnp.transpose(ctx, (1, 0, 2))
    o_ref[...] = ctx.reshape(o_ref.shape).astype(o_ref.dtype)

    if wm_refs:  # need_weights: per-(batch, head-group) partial of the head mean
        wm_ref, = wm_refs
        wm = jnp.sum(p, axis=0) * inv_num_heads                 # (tq, S)
        wm_ref[...] = wm.reshape(wm_ref.shape).astype(wm_ref.dtype)


def _attn_tiles(t, s, num_heads, head_dim, need_weights):
    tq = _pick_tile(t, 256, 8)
    while True:
        for g in _divisors_desc(num_heads):
            need = (4 * g * s * head_dim            # K + V, double buffered
                    + 2 * g * tq * head_dim         # q blocks
                    + 2 * tq * g * head_dim         # ctx output blocks
                    + (2 * tq * s if need_weights else 0)
                    + 3 * g * tq * s) * 4           # scores / exp temporaries
            if need <= _TILE_BUDGET:
                return tq, g
        if tq <= 8 or tq >= t:
            return tq, 1
        new_tq = _pick_tile(t, max(8, tq // 2), 8)
        if new_tq >= tq:
            return tq, 1
        tq = new_tq


def attention_heads(qkv_hm, tgt_len, bsz, num_heads, head_dim, *, need_weights=True):
    """qkv_hm: (3*B*H, T, dh) heads-major stacked q/k/v.
    Returns ctx (B, hg, T, g*dh) and, if need_weights, the per-head-group
    partial head-mean weights (B, hg, T, S) fp32."""
    src_len = tgt_len  # self-attention
    tq, g = _attn_tiles(tgt_len, src_len, num_heads, head_dim, need_weights)
    hg = num_heads // g

    kernel = functools.partial(_attn_kernel, inv_num_heads=1.0 / num_heads)
    ctx_shape = jax.ShapeDtypeStruct((bsz, hg, tgt_len, g * head_dim), qkv_hm.dtype)
    ctx_spec = pl.BlockSpec((1, 1, tq, g * head_dim),
                            lambda b, hi, ti: (b, hi, ti, 0))
    if need_weights:
        out_shape = (ctx_shape,
                     jax.ShapeDtypeStruct((bsz, hg, tgt_len, src_len), jnp.float32))
        out_specs = (ctx_spec,
                     pl.BlockSpec((1, 1, tq, src_len),
                                  lambda b, hi, ti: (b, hi, ti, 0)))
    else:
        out_shape = ctx_shape
        out_specs = ctx_spec

    outs = pl.pallas_call(
        kernel,
        out_shape=out_shape,
        grid=(bsz, hg, tgt_len // tq),
        in_specs=[
            # The same heads-major array is read three times; the leading index
            # selects q / k / v.  K and V indices do not depend on ti.
            pl.BlockSpec((g, tq, head_dim),
                         lambda b, hi, ti: (b * hg + hi, ti, 0)),
            pl.BlockSpec((g, src_len, head_dim),
                         lambda b, hi, ti: ((bsz + b) * hg + hi, 0, 0)),
            pl.BlockSpec((g, src_len, head_dim),
                         lambda b, hi, ti: ((2 * bsz + b) * hg + hi, 0, 0)),
        ],
        out_specs=out_specs,
        compiler_params=_compiler_params(
            # Every (b, head-group, q-tile) step writes fresh output blocks, so
            # all axes can be sharded across TensorCores (keeps both v7x cores
            # busy even for tiny batch * head-group extents).
            dimension_semantics=("parallel", "parallel", "parallel"),
            vmem_limit_bytes=_VMEM_LIMIT),
    )(qkv_hm, qkv_hm, qkv_hm)
    if need_weights:
        return outs[0], outs[1]
    return outs, None


# ---------------------------------------------------------------------------
# Kernel 3: output projection with built-in head gather; writes (T, B, E).
# ---------------------------------------------------------------------------
def _out_proj_kernel(a_ref, w_ref, b_ref, o_ref, *, tm, bsz):
    a = a_ref[...]                              # (B, hg, tm, g*dh)
    # In-VMEM relayout to (t, b)-major rows with E columns in head order;
    # replaces the wrapper-side HBM transpose before the output projection.
    a = jnp.transpose(a, (2, 0, 1, 3))          # (tm, B, hg, g*dh)
    a = a.reshape(tm * bsz, -1)                 # (tm*B, E)
    y = lax.dot_general(a, w_ref[...],
                        dimension_numbers=(((1,), (1,)), ((), ())),
                        preferred_element_type=jnp.float32)
    y = y + b_ref[...].astype(jnp.float32)      # (1, tn) broadcast
    o_ref[...] = y.reshape(o_ref.shape).astype(o_ref.dtype)


def output_projection(ctx, o_w, o_b, tgt_len, bsz, embed_dim):
    """ctx: (B, hg, T, g*dh); o_w: (E, E) torch layout; o_b: (E,) -> (T, B, E)."""
    _, hg, _, gdh = ctx.shape
    tn = _pick_tile(embed_dim, 512, 128)
    tm = _pick_tile(tgt_len, 128, 8)
    # Keep the full-(B, E) activation slab + weight block within budget.
    while tm > 8 and (2 * bsz * tm * embed_dim + 2 * tn * embed_dim
                      + 2 * tm * bsz * tn) * 4 > _TILE_BUDGET:
        nm = _pick_tile(tgt_len, max(8, tm // 2), 8)
        if nm >= tm:
            break
        tm = nm

    kernel = functools.partial(_out_proj_kernel, tm=tm, bsz=bsz)
    return pl.pallas_call(
        kernel,
        out_shape=jax.ShapeDtypeStruct((tgt_len, bsz, embed_dim), ctx.dtype),
        grid=(tgt_len // tm, embed_dim // tn),
        in_specs=[
            pl.BlockSpec((bsz, hg, tm, gdh), lambda i, j: (0, 0, i, 0)),
            pl.BlockSpec((tn, embed_dim), lambda i, j: (j, 0)),
            pl.BlockSpec((1, tn), lambda i, j: (0, j)),
        ],
        out_specs=pl.BlockSpec((tm, bsz, tn), lambda i, j: (i, 0, j)),
        compiler_params=_compiler_params(
            dimension_semantics=("parallel", "parallel"),
            vmem_limit_bytes=_VMEM_LIMIT),
    )(ctx, o_w, o_b.reshape(1, embed_dim))


# ---------------------------------------------------------------------------
# Parameters (deterministic, xavier-uniform like reset_parameters)
# ---------------------------------------------------------------------------
def _xavier_uniform(key, shape, gain=1.0):
    fan_out, fan_in = shape
    a = gain * math.sqrt(6.0 / (fan_in + fan_out))
    return jax.random.uniform(key, shape, jnp.float32, -a, a)


def init_params(key, embed_dim):
    ks = jax.random.split(key, 8)
    g = 1.0 / math.sqrt(2.0)
    return {
        "k_w": _xavier_uniform(ks[0], (embed_dim, embed_dim), g),
        "k_b": jax.random.normal(ks[1], (embed_dim,), jnp.float32) * 0.02,
        "v_w": _xavier_uniform(ks[2], (embed_dim, embed_dim), g),
        "v_b": jax.random.normal(ks[3], (embed_dim,), jnp.float32) * 0.02,
        "q_w": _xavier_uniform(ks[4], (embed_dim, embed_dim), g),
        "q_b": jax.random.normal(ks[5], (embed_dim,), jnp.float32) * 0.02,
        "o_w": _xavier_uniform(ks[6], (embed_dim, embed_dim), 1.0),
        "o_b": jnp.zeros((embed_dim,), jnp.float32),
    }


def prepare_params(params, num_heads):
    """Fold the 1/sqrt(head_dim) query scaling into the q projection and stack
    the q/k/v weights once (hoisted out of the per-call forward path)."""
    embed_dim = params["q_w"].shape[0]
    head_dim = embed_dim // num_heads
    scaling = head_dim ** (-0.5)
    qkv_w = jnp.concatenate(
        [params["q_w"] * scaling, params["k_w"], params["v_w"]], axis=0)  # (3E, E)
    qkv_b = jnp.concatenate(
        [params["q_b"] * scaling, params["k_b"], params["v_b"]], axis=0)  # (3E,)
    return {
        "qkv_w": qkv_w,
        "qkv_b": qkv_b.reshape(3, num_heads, head_dim),
        "o_w": params["o_w"],
        "o_b": params["o_b"],
    }


# ---------------------------------------------------------------------------
# Forward pass (self-attention, no masks, no incremental state, eval mode)
# ---------------------------------------------------------------------------
def multihead_attention_forward(fused, query, num_heads, *, need_weights=True):
    tgt_len, bsz, embed_dim = query.shape
    head_dim = embed_dim // num_heads
    assert head_dim * num_heads == embed_dim
    assert embed_dim % 8 == 0, "embed_dim must be a multiple of 8 for TPU tiling"

    # 1) fused QKV projection, heads-major output straight from the out_spec.
    x = query.reshape(tgt_len * bsz, embed_dim)          # free reshape, (t,b) rows
    qkv_hm = qkv_projection(x, fused["qkv_w"], fused["qkv_b"],
                            tgt_len, bsz, num_heads, head_dim)

    # 2) attention: (batch, head-group, q-tile) grid, K/V resident per group.
    ctx, wts = attention_heads(qkv_hm, tgt_len, bsz, num_heads, head_dim,
                               need_weights=need_weights)

    # 3) output projection gathers the heads in VMEM and writes (T, B, E).
    attn = output_projection(ctx, fused["o_w"], fused["o_b"],
                             tgt_len, bsz, embed_dim)

    attn_weights = None
    if need_weights:
        # Head-group partials -> mean over heads (1/H already applied in-kernel;
        # the hg axis is 1 whenever VMEM allows, making this a free squeeze).
        attn_weights = jnp.sum(wts, axis=1)
    # TODO(synk): dropout, attn_mask / key_padding_mask, bias_k/v, add_zero_attn,
    # incremental_state, need_head_weights and a bf16 matmul path (not exercised
    # by the module defaults) are omitted.
    return attn, attn_weights


# Pure-jnp reference (mirrors the PyTorch module math) for correctness check.
def reference_forward(params, query, num_heads):
    tgt_len, bsz, embed_dim = query.shape
    head_dim = embed_dim // num_heads
    scaling = head_dim ** (-0.5)
    x = query.reshape(tgt_len * bsz, embed_dim)
    q = x @ params["q_w"].T + params["q_b"]
    k = x @ params["k_w"].T + params["k_b"]
    v = x @ params["v_w"].T + params["v_b"]
    q = q * scaling
    th = lambda t: t.reshape(tgt_len, bsz * num_heads, head_dim).transpose(1, 0, 2)
    qh, kh, vh = th(q), th(k), th(v)
    scores = jnp.einsum("btd,bsd->bts", qh, kh).astype(jnp.float32)
    w = jax.nn.softmax(scores, axis=-1)
    attn = jnp.einsum("bts,bsd->btd", w.astype(vh.dtype), vh)
    attn = attn.transpose(1, 0, 2).reshape(tgt_len, bsz, embed_dim)
    attn = attn.reshape(-1, embed_dim) @ params["o_w"].T + params["o_b"]
    attn = attn.reshape(tgt_len, bsz, embed_dim)
    aw = w.reshape(bsz, num_heads, tgt_len, -1).transpose(1, 0, 2, 3).mean(0)
    return attn, aw


if __name__ == "__main__":
    key = jax.random.PRNGKey(0)
    tgt_len, bsz, embed_dim, num_heads = 8, 2, 32, 4

    pkey, qkey = jax.random.split(key)
    params = init_params(pkey, embed_dim)
    query = jax.random.normal(qkey, (tgt_len, bsz, embed_dim), jnp.float32)

    fused = prepare_params(params, num_heads)   # hoisted out of the forward path
    attn, attn_weights = multihead_attention_forward(fused, query, num_heads)
    jax.block_until_ready(attn)
    jax.block_until_ready(attn_weights)

    ref_attn, ref_w = reference_forward(params, query, num_heads)
    assert attn.shape == (tgt_len, bsz, embed_dim)
    assert attn_weights.shape == (bsz, tgt_len, tgt_len)
    assert jnp.allclose(attn, ref_attn, atol=1e-3, rtol=1e-3), \
        float(jnp.max(jnp.abs(attn - ref_attn)))
    assert jnp.allclose(attn_weights, ref_w, atol=1e-3, rtol=1e-3), \
        float(jnp.max(jnp.abs(attn_weights - ref_w)))

    print("KERNEL_OK")
</pallas_src>

<mosaic_0001>
module attributes {stable_mosaic.version = 11 : i64} {
  func.func @_qkv_proj_kernel(%arg0: i32, %arg1: i32, %arg2: i32, %arg3: memref<16x32xf32, #tpu.memory_space<vmem>>, %arg4: memref<32x32xf32, #tpu.memory_space<vmem>>, %arg5: memref<1x4x8xf32, #tpu.memory_space<vmem>>, %arg6: memref<8x8x8xf32, #tpu.memory_space<vmem>>, %arg7: memref<16x32xf32, #tpu.memory_space<vmem>>) attributes {dimension_semantics = [#tpu.dimension_semantics<parallel>, #tpu.dimension_semantics<parallel>, #tpu.dimension_semantics<arbitrary>], iteration_bounds = array<i64: 1, 3, 1>, scalar_prefetch = 0 : i64, scratch_operands = 1 : i64, tpu.core_type = #tpu.core_type<tc>, window_params = [{transform_indices = @transform_0, window_bounds = array<i64: 16, 32>}, {transform_indices = @transform_1, window_bounds = array<i64: 32, 32>}, {transform_indices = @transform_2, window_bounds = array<i64: 1, 4, 8>}, {transform_indices = @transform_3, window_bounds = array<i64: 8, 8, 8>}]} {
    %c0_i32 = arith.constant 0 : i32
    %0 = arith.cmpi eq, %arg2, %c0_i32 : i32
    %1 = arith.extui %0 : i1 to i32
    %c0_i32_0 = arith.constant 0 : i32
    %2 = arith.cmpi ne, %1, %c0_i32_0 : i32
    scf.if %2 {
      %cst_10 = arith.constant 0.000000e+00 : f32
      %12 = vector.broadcast %cst_10 : f32 to vector<16x32xf32>
      %c0_11 = arith.constant 0 : index
      %c0_12 = arith.constant 0 : index
      %13 = vector.load %arg7[%c0_11, %c0_12] : memref<16x32xf32, #tpu.memory_space<vmem>>, vector<16x32xf32>
      tpu.vector_store %arg7[%c0_11, %c0_12], %12 {strides = array<i32>} : memref<16x32xf32, #tpu.memory_space<vmem>>, vector<16x32xf32>,
    } else {
    }
    %c0 = arith.constant 0 : index
    %c0_1 = arith.constant 0 : index
    %3 = vector.load %arg7[%c0, %c0_1] : memref<16x32xf32, #tpu.memory_space<vmem>>, vector<16x32xf32>
    %c0_2 = arith.constant 0 : index
    %c0_3 = arith.constant 0 : index
    %4 = vector.load %arg3[%c0_2, %c0_3] : memref<16x32xf32, #tpu.memory_space<vmem>>, vector<16x32xf32>
    %c0_4 = arith.constant 0 : index
    %c0_5 = arith.constant 0 : index
    %5 = vector.load %arg4[%c0_4, %c0_5] : memref<32x32xf32, #tpu.memory_space<vmem>>, vector<32x32xf32>
    %cst = arith.constant dense<0.000000e+00> : vector<16x32xf32>
    %6 = tpu.matmul %4, %5, %cst {dimension_numbers = #tpu.dot_dimension_numbers<[1], [1], [0], [0], [0, 0, 1, 0], [], []>} : vector<16x32xf32>, vector<32x32xf32>, vector<16x32xf32> -> vector<16x32xf32>
    %7 = arith.addf %3, %6 : vector<16x32xf32>
    %c0_6 = arith.constant 0 : index
    %c0_7 = arith.constant 0 : index
    %8 = vector.load %arg7[%c0_6, %c0_7] : memref<16x32xf32, #tpu.memory_space<vmem>>, vector<16x32xf32>
    tpu.vector_store %arg7[%c0_6, %c0_7], %7 {strides = array<i32>} : memref<16x32xf32, #tpu.memory_space<vmem>>, vector<16x32xf32>,
    %c0_i32_8 = arith.constant 0 : i32
    %9 = arith.cmpi eq, %arg2, %c0_i32_8 : i32
    %10 = arith.extui %9 : i1 to i32
    %c0_i32_9 = arith.constant 0 : i32
    %11 = arith.cmpi ne, %10, %c0_i32_9 : i32
    scf.if %11 {
      %c0_10 = arith.constant 0 : index
      %c0_11 = arith.constant 0 : index
      %12 = vector.load %arg7[%c0_10, %c0_11] : memref<16x32xf32, #tpu.memory_space<vmem>>, vector<16x32xf32>
      %c0_12 = arith.constant 0 : index
      %c0_13 = arith.constant 0 : index
      %c0_14 = arith.constant 0 : index
      %13 = vector.load %arg5[%c0_12, %c0_13, %c0_14] : memref<1x4x8xf32, #tpu.memory_space<vmem>>, vector<1x4x8xf32>
      %14 = vector.shape_cast %13 : vector<1x4x8xf32> to vector<1x32xf32>
      %15 = vector.broadcast %14 : vector<1x32xf32> to vector<16x32xf32>
      %16 = arith.addf %12, %15 : vector<16x32xf32>
      %17 = vector.shape_cast %16 : vector<16x32xf32> to vector<8x2x4x8xf32>
      %18 = tpu.transpose %17, [1, 2, 0, 3] : vector<8x2x4x8xf32> -> vector<2x4x8x8xf32>
      %19 = vector.shape_cast %18 : vector<2x4x8x8xf32> to vector<8x8x8xf32>
      %c0_15 = arith.constant 0 : index
      %c0_16 = arith.constant 0 : index
      %c0_17 = arith.constant 0 : index
      %20 = vector.load %arg6[%c0_15, %c0_16, %c0_17] : memref<8x8x8xf32, #tpu.memory_space<vmem>>, vector<8x8x8xf32>
      tpu.vector_store %arg6[%c0_15, %c0_16, %c0_17], %19 {strides = array<i32>} : memref<8x8x8xf32, #tpu.memory_space<vmem>>, vector<8x8x8xf32>,
    } else {
    }
    return
  }
  func.func @transform_0(%arg0: i32, %arg1: i32, %arg2: i32) -> (i32, i32) {
    %c0_i32 = arith.constant 0 : i32
    return %arg0, %arg2 : i32, i32
  }
  func.func @transform_1(%arg0: i32, %arg1: i32, %arg2: i32) -> (i32, i32) {
    %c0_i32 = arith.constant 0 : i32
    return %arg1, %arg2 : i32, i32
  }
  func.func @transform_2(%arg0: i32, %arg1: i32, %arg2: i32) -> (i32, i32, i32) {
    %c0_i32 = arith.constant 0 : i32
    %c0_i32_0 = arith.constant 0 : i32
    %c0_i32_1 = arith.constant 0 : i32
    return %arg1, %c0_i32, %c0_i32_0 : i32, i32, i32
  }
  func.func @transform_3(%arg0: i32, %arg1: i32, %arg2: i32) -> (i32, i32, i32) {
    %c0_i32 = arith.constant 0 : i32
    %c0_i32_0 = arith.constant 0 : i32
    return %arg1, %arg0, %c0_i32 : i32, i32, i32
  }
}

</mosaic_0001>

<bundles_post_ra>
// kernel: tpu_custom_call.1
= control target key start
LH: loop header
LB: loop body
LE: loop exit
PB: predicated region body
PF: predicated region fallthrough
CT: control target
= control target key end

     0   :  { %s1564_s0 = inlined_call_operand.hbm [shape: f32[16,32], index: 0, kind: input, shape index: {}]   ;;  %s1565_s1 = inlined_call_operand.hbm [shape: f32[96,32], index: 1, kind: input, shape index: {}]   ;;  %s1566_s2 = inlined_call_operand.hbm [shape: f32[3,4,8], index: 2, kind: input, shape index: {}]   ;;  %s1567_s3 = inlined_call_operand.hbm [shape: f32[24,8,8], index: 3, kind: output, shape index: {}]  }
   0x1   :  { %1578 = sst [smem:[#allocation14_spill]] %s1565_s1 }
   0x2   :  { %8 = vsyncpa [#allocation4], 0 }
   0x3   :  { %9 = vsyncpa [#allocation7], 0 }
   0x4   :  { %11 = vsyncpa [#allocation7 + $0x1], 0 }
   0x5   :  { %12 = vsyncpa [#allocation5], 0 }
   0x6   :  { %14 = vsyncpa [#allocation5 + $0x1], 0  ;;  %s1246_s12 = smov 0   ;;  %s1248_s13 = smov 0  }
   0x7   :  { %s1250_s14 = smov 0   ;;  %s1252_s15 = smov 0  }
   0x8   :  { %s1254_s16 = smov 0   ;;  %s1256_s17 = smov 0  }
   0x9 LB: > { %s35_s18 = sadd.s32 1, %s1204_s16  ;;  %s76_s19 = sadd.s32 1, %s1196_s14  ;;  %s1208_s17 = sphi %s1256_s17, %s20_s17   ;;  %s1204_s16 = sphi %s1254_s16, %s1606_s16   ;;  %s1200_s15 = sphi %s1252_s15, %s1605_s15   ;;  %s1196_s14 = sphi %s1250_s14, %s1604_s14   ;;  %s1192_s13 = sphi %s1248_s13, %s1603_s13   ;;  %s1188_s12 = sphi %s1246_s12, %s1602_s12  }
   0xa   : > { %p37_p0 = scmp.ge.s32.totalorder %s35_s18, 3  ;;  %p83_p1 = scmp.ne.s32.totalorder %s1196_s14, %s1192_s13 }
   0xb   : > { %p84_p2 = scmp.eq.s32.totalorder %s1208_s17, 0  ;;  %p970_p5 = scmp.lt.s32.totalorder %s1208_s17, 3 }
   0xc   : > { %s1608_s18 = smov (%p37_p0, %s35_s18), 0  ;;  %s184_s22 = sand.u32 1, %s1208_s17  }
   0xd   : > { %1579 = sst [smem:[#allocation13_spill]] %s1608_s18  ;;  %p1286_p3 = por %p84_p2, %p83_p1 }
   0xe   : > { %s71_s21 = ssub.s32 %s1204_s16, %s1608_s18  ;;  %s186_s23 = sand.u32 1, %s1196_s14  }
   0xf   : > { %p74_p4 = scmp.eq.s32.totalorder %s71_s21, 0  ;;  %s887_s25 = sshll.u32 %s186_s23, 5 }
  0x10   : > { %s913_s26 = sshll.u32 %s1204_s16, 9  ;;  %s1581_s1 = sld [smem:[#allocation14_spill]] }
  0x11   : > { %s1296_s24 = scalar_select %p74_p4, %s1196_s14, %s76_s19  }
  0x12   : > { %s188_s30 = scalar_lea.vmem [#allocation6], %s887_s25  ;;  %p1310_p6 = pnand %p970_p5, %p1286_p3 }
  0x13   : > { %s196_s4 = sshll.u32 %s188_s30, 4  ;;  %s1314_s6 = scalar_lea.sflag [#allocation7], %s184_s22  ;;  %s1306_s4 = int_to_ptr.vmem [resolvable:$true] %s196_s4 }
  0x14   : > { %s1582_s5 = scalar_select %p1310_p6, 1, 0 }
  0x15   : > { %p1572_p8 = pneg %p1310_p6 }
  0x16   : > { %s1304_s29 = scalar_lea.hbm %s1581_s1, %s913_s26  ;;  %s1039_s10 = scalar_lea.hbm %s1581_s1, 1536 }
  0x17   : > { %s1034_s7 = scalar_lea.hbm %s1304_s29, 512  ;;  %p1040_p11 = scmp.lt.u32.totalorder %s1304_s29, %s1581_s1 }
  0x18   : > { %p1035_p7 = scmp.ne.s32.totalorder %s1304_s29, %s1034_s7  ;;  %p1041_p12 = scmp.lt.u32.totalorder %s1039_s10, %s1034_s7 }
  0x19   : > { %p1043_p0 = scmp.lt.u32.totalorder %s1034_s7, %s1304_s29 }
  0x1a   : > { %p1037_p9 = pnand %p1572_p8, %p1035_p7  ;;  %p1042_p13 = por %p1041_p12, %p1040_p11 }
  0x1c   : > { %p1038_p10 = pneg %p1037_p9  ;;  %p1044_p2 = por %p1043_p0, %p1042_p13 }
  0x1e   : > { %p1045_p3 = pnand %p1044_p2, %p1038_p10 }
  0x20   : > { %1048 = shalt.err (!%p1045_p3)
}
  0x21   : > { %s1049_s20 = scalar_lea.vmem %s1306_s4, 512  ;;  %s1210_s21 = smov [#allocation6]  }
  0x22   : > { %p1050_p4 = scmp.ne.s32.totalorder %s1306_s4, %s1049_s20  ;;  %s1054_s22 = sshll.u32 %s1210_s21, 4  ;;  %s1055_s22 = int_to_ptr.vmem [resolvable:$false] %s1054_s22 }
  0x23   : > { %s1056_s25 = scalar_lea.vmem %s1055_s22, 1024  ;;  %p1057_p9 = scmp.lt.s32.totalorder %s1306_s4, %s1055_s22 }
  0x24   : > { %p1052_p5 = pnand %p1050_p4, %p1572_p8  ;;  %p1058_p11 = scmp.lt.s32.totalorder %s1056_s25, %s1049_s20 }
  0x26   : > { %p1053_p7 = pneg %p1052_p5  ;;  %p1059_p12 = por %p1058_p11, %p1057_p9 }
  0x28   : > { %p1060_p13 = pnand %p1059_p12, %p1053_p7 }
  0x2a   : > { %1063 = shalt.err (!%p1060_p13)
}
  0x2b   : > { %s1568_s26 = smov 128   ;;  %s1569_s27 = smov 8  }
  0x2c   : > { %961 = dma.hbm_to_vmem [thread:$0]  (!%p1310_p6), %s1304_s29, 512, %s1306_s4, %s1314_s6, %s1568_s26, %s1568_s26, %s1569_s27  }
  0x2d   : > { %s1346_s28 = sadd.s32 4294967295, %s1208_s17   ;;  %s883_s30 = sadd.s32 4294967294, %s1208_s17  }
  0x2e   : > { %p89_p10 = scmp.ne.s32.totalorder %s1192_s13, %s1188_s12  ;;  %p1571_p0 = scmp.eq.s32.totalorder %s1346_s28, 0 }
  0x2f   : > { %p141_p2 = scmp.eq.s32.totalorder %s1346_s28, 2  ;;  %p147_p3 = scmp.eq.s32.totalorder %s883_s30, 2 }
  0x30   : > { %p884_p4 = scmp.ge.s32.totalorder %s1208_s17, 1  ;;  %p1356_p5 = por %p1571_p0, %p89_p10 }
  0x31   : > { %p1363_p7 = por %p141_p2, %p83_p1  ;;  %p1367_p9 = por %p147_p3, %p89_p10 }
  0x32   : > { %s1583_s7 = scalar_select %p1356_p5, 1, 0 }
  0x33   : > { %s1584_s29 = scalar_select %p1363_p7, 1, 0 }
  0x34   : > { %s1585_s4 = scalar_select %p1367_p9, 1, 0 }
  0x35   : > { %p154_p11 = scmp.lt.s32.totalorder %s1208_s17, 4  ;;  %s1213_s9 = smov [#allocation3]  }
  0x36   : > { %s170_s10 = sshll.u32 %s1213_s9, 4  ;;  %s890_s11 = sshll.u32 %s186_s23, 2  ;;  %s171_s10 = int_to_ptr.vmem [resolvable:$true] %s170_s10 }
  0x37   : > { %p1372_p12 = pnand %p884_p4, %p154_p11  ;;  %s891_s19 = sshll.u32 %s1204_s16, 6 }
  0x38   : > { %s210_s20 = scalar_lea.vmem [#allocation8], %s890_s11  ;;  %s1390_s26 = scalar_lea.hbm %s1566_s2, %s891_s19 }
  0x39   : > { %s1586_s8 = scalar_select %p1372_p12, 1, 0 }
  0x3a   : > { %p954_p13 = pneg %p1372_p12  ;;  %s217_s21 = sshll.u32 %s210_s20, 4  ;;  %s1392_s21 = int_to_ptr.vmem [resolvable:$true] %s217_s21 }
  0x3b   : > { %s1064_s27 = scalar_lea.hbm %s1564_s0, 256 }
  0x3c   : > { %p1383_p1 = pnand %p954_p13, %p1571_p0  ;;  %p1065_p10 = scmp.ne.s32.totalorder %s1564_s0, %s1064_s27 }
  0x3d   : > { %p1071_p11 = scmp.lt.u32.totalorder %s1064_s27, %s1564_s0 }
  0x3e   : > { %p1066_p2 = pneg %p1383_p1 }
  0x40   : > { %p1067_p3 = pnand %p1066_p2, %p1065_p10 }
  0x42   : > { %p1068_p4 = pneg %p1067_p3 }
  0x44   : > { %p1073_p13 = pnand %p1071_p11, %p1068_p4 }
  0x46   : > { %1076 = shalt.err (!%p1073_p13)
}
  0x47   : > { %s1077_s19 = scalar_lea.vmem %s171_s10, 256  ;;  %p1085_p7 = scmp.lt.s32.totalorder %s171_s10, %s171_s10 }
  0x48   : > { %p1078_p0 = scmp.ne.s32.totalorder %s171_s10, %s1077_s19  ;;  %p1086_p5 = scmp.lt.s32.totalorder %s1077_s19, %s1077_s19 }
  0x4a   : > { %p1080_p8 = pnand %p1078_p0, %p1066_p2  ;;  %p1087_p12 = por %p1086_p5, %p1085_p7 }
  0x4c   : > { %p1081_p9 = pneg %p1080_p8 }
  0x4e   : > { %p1088_p6 = pnand %p1087_p12, %p1081_p9 }
  0x50   : > { %1091 = shalt.err (!%p1088_p6)
}
  0x51   : > { %s1588_s25 = smov 8   ;;  %s1589_s30 = smov 128  }
  0x52   : > { %957 = dma.hbm_to_vmem [thread:$0]  (!%p1383_p1), %s1564_s0, 256, %s171_s10, [#allocation4], %s1589_s30, %s1589_s30, %s1588_s25  }
  0x53   : > { %s1092_s1 = scalar_lea.hbm %s1390_s26, 64  ;;  %p1590_p0 = scmp.ne.s32.totalorder %s1582_s5, 0 }
  0x54   : > { %p1093_p8 = scmp.ne.s32.totalorder %s1390_s26, %s1092_s1  ;;  %s1097_s22 = scalar_lea.hbm %s1566_s2, 192 }
  0x55   : > { %p1591_p5 = pneg %p1590_p0  ;;  %p1098_p9 = scmp.lt.u32.totalorder %s1390_s26, %s1566_s2 }
  0x56   : > { %p1099_p12 = scmp.lt.u32.totalorder %s1097_s22, %s1092_s1  ;;  %p1101_p2 = scmp.lt.u32.totalorder %s1092_s1, %s1390_s26 }
  0x57   : > { %p1095_p7 = pnand %p1093_p8, %p1591_p5 }
  0x58   : > { %p1100_p10 = por %p1099_p12, %p1098_p9 }
  0x59   : > { %p1096_p6 = pneg %p1095_p7 }
  0x5a   : > { %p1102_p3 = por %p1101_p2, %p1100_p10 }
  0x5c   : > { %p1103_p4 = pnand %p1102_p3, %p1096_p6 }
  0x5e   : > { %1106 = shalt.err (!%p1103_p4)
}
  0x5f   : > { %s1107_s10 = scalar_lea.vmem %s1392_s21, 64  ;;  %p1592_p11 = pmov %p1591_p5 }
  0x60   : > { %p1108_p1 = scmp.ne.s32.totalorder %s1392_s21, %s1107_s10  ;;  %s1214_s19 = smov [#allocation8]  }
  0x61   : > { %s1112_s25 = sshll.u32 %s1214_s19, 4  ;;  %s1113_s25 = int_to_ptr.vmem [resolvable:$false] %s1112_s25 }
  0x62   : > { %p1110_p13 = pnand %p1108_p1, %p1592_p11  ;;  %s1114_s30 = scalar_lea.vmem %s1113_s25, 128 }
  0x63   : > { %p1115_p5 = scmp.lt.s32.totalorder %s1392_s21, %s1113_s25  ;;  %p1116_p7 = scmp.lt.s32.totalorder %s1114_s30, %s1107_s10 }
  0x64   : > { %p1111_p8 = pneg %p1110_p13 }
  0x65   : > { %p1117_p9 = por %p1116_p7, %p1115_p5 }
  0x67   : > { %p1118_p12 = pnand %p1117_p9, %p1111_p8 }
  0x69   : > { %1121 = shalt.err (!%p1118_p12)
}
  0x6a   : > { %964 = dma.hbm_to_vmem [thread:$0]  (!%p1590_p0), %s1390_s26, 64, %s1392_s21, %s1314_s6  }
  0x6b   : > { %p1593_p6 = scmp.ne.s32.totalorder %s1586_s8, 0 }
  0x6c   : > { %p1594_p10 = scmp.eq.s32.totalorder (!%p1593_p6), %s1346_s28, 0 }
  0x6d   : > { %226 = sbr.rel (%p1593_p6) target bundleno = 526 (0x20e), region = 32 }
  0x74   : > { %1175 = dma.done.wait (%p1594_p10), [#allocation4], 256   ;;  %p1595_p2 = pmov %p1594_p10 }
  0x75   : > { %s232_s23 = sand.u32 1, %s1346_s28   ;;  %s1445_s9 = sand.u32 1, %s1192_s13  }
  0x76   : > { %1177 = vsyncadd (%p1595_p2), [#allocation4], 4294967040  ;;  %s894_s5 = sshll.u32 %s1445_s9, 5  ;;  %s233_s1 = scalar_lea.sflag [#allocation7], %s232_s23 }
  0x77   : > { %s236_s18 = scalar_lea.vmem [#allocation6], %s894_s5  ;;  %p1596_p0 = scmp.ne.s32.totalorder %s1583_s7, 0 }
  0x79   : > { %1179 = dma.done.wait (%p1596_p0), %s233_s1, 576  }
  0x7a   : > { %1181 = vsyncadd (%p1596_p0), %s233_s1, 4294966720  ;;  %vm280_vm0 = vcmask 261120   ;;  %v406_v0 = vlaneseq  ;;  %v1215_v1 = vmov 1934713408   ;;  %v1216_v3 = vmov 0.0   ;;  %s895_s6 = sshll.u32 %s1445_s9, 2 }
  0x7b   : > { %v404_v2 = vunpack.c.l.s4 %v1215_v1  ;;  %281 = vst.msk [vmem:[#allocation2] sm:$0xff] %vm280_vm0, %v1216_v3  ;;  %282 = vst.msk [vmem:[#allocation2 + $0x8] sm:$0xff] %vm280_vm0, %v1216_v3  ;;  %v287_v8 = vld [vmem:[%s236_s18] sm:$0xff]  ;;  %v288_v9 = vld [vmem:[%s236_s18 + $0x8] sm:$0xff]  ;;  %s245_s26 = scalar_lea.vmem [#allocation8], %s895_s6  ;;  %s1217_s28 = smov 8  }
  0x7c   : > { %v1454_v4 = vshrl.u32 %v406_v0, 7  ;;  %vm1459_vm1 = vmpackc.low %vm280_vm0, %vm280_vm0  ;;  %v289_v10 = vld [vmem:[%s236_s18 + $0x10] sm:$0xff]  ;;  %v932_v11 = vpack.c.bf16 %v288_v9, %v287_v8  ;;  %v290_v12 = vld [vmem:[%s236_s18 + $0x18] sm:$0xff]  ;;  %s1218_s7 = smov 24   ;;  %s1219_s8 = smov 16   ;;  %vm431_vm2 = vcmask 64512  }
  0x7d   : > { %v405_v5 = vunpack.c.0.s8 %v404_v2  ;;  %v285_v13 = vld [vmem:[#allocation3] sm:$0xff]  ;;  %v938_v14 = vpack.c.bf16 %v290_v12, %v289_v10  ;;  %v903_v15 = vld.sshfl [vmem:[%s245_s26] sm:$0x33 pattern:$0x76325410]  ;;  %v286_v21 = vld [vmem:[#allocation3 + $0x8] sm:$0xff] }
  0x7e   : > { %929 = vmatprep.mubr.msk.f32.mxu0 %vm280_vm0, %v285_v13  ;;  %934 = vmatprep.subr.msk.bf16.mxu0 %vm1459_vm1, %v932_v11  ;;  %v402_v17 = vcombine.high %v903_v15, %v1216_v3  ;;  %vm433_vm3 = vcmask 130048   ;;  %vm435_vm4 = vcmask 195584   ;;  %v439_v33 = vsub.s32 0, %v1454_v4  ;;  %s1220_s21 = smov 120   ;;  %s1221_s27 = smov 112  }
  0x7f   : > { %v1464_v7 = vsub.s32 %v405_v5, %v1454_v4  ;;  %937 = vmatpush3.bf16.xpose.msk.msra.mxu0 %vm1459_vm1, %v932_v11  ;;  %s1222_s22 = smov 104   ;;  %v1223_v40 = vmov 1983009808   ;;  %s896_s11 = sshll.u32 %s1445_s9, 6 }
  0x80   : > { %940 = vmatprep.subr.msk.bf16.mxu0 %vm1459_vm1, %v938_v14  ;;  %v466_v41 = vunpack.c.l.s4 %v1223_v40  ;;  %s914_s20 = sshll.u32 %s1200_s15, 10  ;;  %s272_s10 = scalar_lea.vmem [#allocation9], %s896_s11 }
  0x81   : > { %v409_v16 = vrot.slane %v903_v15, %v1464_v7  ;;  %v416_v19 = vrot.slane %v402_v17, %v1464_v7  ;;  %s758_s19 = sshll.u32 %s272_s10, 4  ;;  %s1505_s23 = scalar_lea.hbm %s1567_s3, %s914_s20  ;;  %s1507_s19 = int_to_ptr.vmem [resolvable:$true] %s758_s19 }
  0x82   : > { %v284_v23 = vld [vmem:[#allocation2 + $0x8] sm:$0xff]  ;;  %v283_v24 = vld [vmem:[#allocation2] sm:$0xff]  ;;  %v467_v44 = vunpack.c.0.s8 %v466_v41  ;;  %s744_s15 = scalar_lea.sflag [#allocation5], %s1445_s9  ;;  %s1122_s5 = scalar_lea.vmem %s1507_s19, 1024 }
  0x83   : > { %v417_v18 = vcombine.high %v409_v16, %v1216_v3  ;;  %v418_v20 = vcombine.high %v416_v19, %v1216_v3  ;;  %p1123_p3 = scmp.ne.s32.totalorder %s1507_s19, %s1122_s5  ;;  %p1599_p4 = scmp.ne.s32.totalorder %s1584_s29, 0 }
  0x84   : > { %v470_v47 = vsub.s32 %v467_v44, %v1454_v4  ;;  %s1224_s1 = smov [#allocation9]  }
  0x85   : > { %420 = vrot.lane.b32.xlu0 %v417_v18, %s1217_s28  ;;  %428 = vrot.lane.b32.xlu1 %v418_v20, %s1218_s7  ;;  %p1124_p1 = pnand %p1123_p3, %p1599_p4  ;;  %s1126_s18 = sshll.u32 %s1224_s1, 4  ;;  %s1127_s18 = int_to_ptr.vmem [resolvable:$false] %s1126_s18 }
  0x86   : > { %s1128_s6 = scalar_lea.vmem %s1127_s18, 2048  ;;  %p1129_p13 = scmp.lt.s32.totalorder %s1507_s19, %s1127_s18 }
  0x87   : > { %943 = vmatpush3.bf16.xpose.msk.msra.mxu0 %vm1459_vm1, %v938_v14  ;;  %p1125_p11 = pneg %p1124_p1  ;;  %p1130_p8 = scmp.lt.s32.totalorder %s1128_s6, %s1122_s5 }
  0x89   : > { %424 = vrot.lane.b32.xlu0 %v416_v19, %s1219_s8  ;;  %p1131_p5 = por %p1130_p8, %p1129_p13 }
  0x8b   : > { %p1132_p7 = pnand %p1131_p5, %p1125_p11 }
  0x8e   : > { %930 = vmatmul.mubr.msk.f32.vlgmr.msra.gmra.mrb[0].mxu0 %vm280_vm0, %v286_v21 }
  0xf7   : > { %v421_v22 = vpop.permute.xlu0 %420  ;;  %v429_v32 = vpop.permute.xlu1 %428 }
  0xf8   : > { %v432_v25 = vsel %vm431_vm2, %v409_v16, %v421_v22 }
  0xfb   : > { %v425_v27 = vpop.permute.xlu0 %424 }
  0xfc   : > { %v434_v31 = vsel %vm433_vm3, %v432_v25, %v425_v27 }
  0xfd   : > { %v436_v34 = vsel %vm435_vm4, %v434_v31, %v429_v32 }
  0xfe   : > { %v440_v35 = vrot.slane %v436_v34, %v439_v33 }
 0x161   : > { %v931_v26 = vpop.f32.mrb[0].mxu0 }
 0x162   : > { %v386_v28 = vadd.f32 %v931_v26, %v284_v23  ;;  %v376_v29 = vpop.f32.mrb[1].mxu0 }
 0x163   : > { %v385_v30 = vadd.f32 %v376_v29, %v283_v24 }
 0x164   : > { %388 = vst.msk [vmem:[#allocation2 + $0x8] sm:$0xff] %vm280_vm0, %v386_v28 }
 0x165   : > { %387 = vst.msk [vmem:[#allocation2] sm:$0xff] %vm280_vm0, %v385_v30 }
 0x16b   : > { %v393_v36 = vld [vmem:[#allocation2 + $0x8] sm:$0xff] }
 0x16c   : > { %v392_v37 = vld [vmem:[#allocation2] sm:$0xff]  ;;  %v442_v38 = vadd.f32 %v440_v35, %v393_v36 }
 0x16d   : > { %v441_v39 = vadd.f32 %v440_v35, %v392_v37 }
 0x16e   : > { %447 = vrot.lane.b32.xlu0 %v442_v38, %s1220_s21 }
 0x16f   : > { %445 = vrot.lane.b32.xlu1 %v441_v39, %s1220_s21 }
 0x172   : > { %453 = vrot.lane.b32.xlu0 %v442_v38, %s1221_s27 }
 0x173   : > { %451 = vrot.lane.b32.xlu1 %v441_v39, %s1221_s27 }
 0x176   : > { %459 = vrot.lane.b32.xlu0 %v442_v38, %s1222_s22 }
 0x177   : > { %457 = vrot.lane.b32.xlu1 %v441_v39, %s1222_s22 }
 0x1e0   : > { %v448_v42 = vpop.permute.xlu0 %447 }
 0x1e1   : > { %v446_v43 = vpop.permute.xlu1 %445 }
 0x1e4   : > { %v454_v45 = vpop.permute.xlu0 %453 }
 0x1e5   : > { %v452_v46 = vpop.permute.xlu1 %451  ;;  %v531_v48 = vcombine.low %v442_v38, %v454_v45  ;;  %v532_v49 = vcombine.high %v442_v38, %v454_v45 }
 0x1e6   : > { %v463_v50 = vcombine.low %v441_v39, %v452_v46  ;;  %v464_v51 = vcombine.high %v441_v39, %v452_v46 }
 0x1e7   : > { %v539_v58 = vrot.slane %v531_v48, %v470_v47  ;;  %v546_v59 = vrot.slane %v532_v49, %v470_v47 }
 0x1e8   : > { %v460_v52 = vpop.permute.xlu0 %459  ;;  %v471_v62 = vrot.slane %v463_v50, %v470_v47  ;;  %v478_v63 = vrot.slane %v464_v51, %v470_v47 }
 0x1e9   : > { %v547_v53 = vcombine.low %v448_v42, %v460_v52  ;;  %v548_v54 = vcombine.high %v448_v42, %v460_v52  ;;  %v458_v55 = vpop.permute.xlu1 %457 }
 0x1ea   : > { %v479_v56 = vcombine.low %v446_v43, %v458_v55  ;;  %v480_v57 = vcombine.high %v446_v43, %v458_v55 }
 0x1eb   : > { %v555_v60 = vrot.slane %v547_v53, %v470_v47  ;;  %v562_v61 = vrot.slane %v548_v54, %v470_v47 }
 0x1ec   : > { %v487_v0 = vrot.slane %v479_v56, %v470_v47  ;;  %v494_v1 = vrot.slane %v480_v57, %v470_v47 }
 0x1ed   : > { %v563_v2 = vcombine.low %v539_v58, %v555_v60  ;;  %v564_v3 = vcombine.high %v539_v58, %v555_v60  ;;  %v579_v4 = vcombine.low %v546_v59, %v562_v61  ;;  %v580_v5 = vcombine.high %v546_v59, %v562_v61 }
 0x1ee   : > { %v495_v6 = vcombine.low %v471_v62, %v487_v0  ;;  %v496_v8 = vcombine.high %v471_v62, %v487_v0  ;;  %v511_v9 = vcombine.low %v478_v63, %v494_v1  ;;  %v512_v10 = vcombine.high %v478_v63, %v494_v1 }
 0x1ef   : > { %v571_v11 = vrot.slane %v563_v2, %v1464_v7  ;;  %v578_v12 = vrot.slane %v564_v3, %v1464_v7  ;;  %v587_v13 = vrot.slane %v579_v4, %v1464_v7  ;;  %v594_v14 = vrot.slane %v580_v5, %v1464_v7 }
 0x1f0   : > { %v503_v15 = vrot.slane %v495_v6, %v1464_v7  ;;  %v510_v16 = vrot.slane %v496_v8, %v1464_v7  ;;  %v519_v17 = vrot.slane %v511_v9, %v1464_v7  ;;  %v526_v18 = vrot.slane %v512_v10, %v1464_v7 }
 0x1f1   : > { %v615_v19 = vcombine.low %v571_v11, %v587_v13  ;;  %v623_v20 = vcombine.low %v578_v12, %v594_v14  ;;  %v906_v21 = vcombine.high %v571_v11, %v587_v13  ;;  %v907_v22 = vcombine.high %v578_v12, %v594_v14 }
 0x1f2   : > { %v599_v23 = vcombine.low %v503_v15, %v519_v17  ;;  %v607_v24 = vcombine.low %v510_v16, %v526_v18  ;;  %v904_v25 = vcombine.high %v503_v15, %v519_v17  ;;  %v905_v26 = vcombine.high %v510_v16, %v526_v18 }
 0x1f3   : > { %v622_v27 = vrot.slane %v615_v19, %v470_v47  ;;  %v630_v28 = vrot.slane %v623_v20, %v470_v47  ;;  %v690_v29 = vrot.slane %v906_v21, %v470_v47  ;;  %v698_v30 = vrot.slane %v907_v22, %v470_v47 }
 0x1f4   : > { %v606_v31 = vrot.slane %v599_v23, %v470_v47  ;;  %v614_v32 = vrot.slane %v607_v24, %v470_v47  ;;  %v674_v33 = vrot.slane %v904_v25, %v470_v47  ;;  %v682_v34 = vrot.slane %v905_v26, %v470_v47 }
 0x1f5   : > { %v647_v35 = vcombine.low %v622_v27, %v630_v28  ;;  %v648_v36 = vcombine.high %v622_v27, %v630_v28  ;;  %v715_v37 = vcombine.low %v690_v29, %v698_v30  ;;  %v716_v38 = vcombine.high %v690_v29, %v698_v30 }
 0x1f6   : > { %v631_v39 = vcombine.low %v606_v31, %v614_v32  ;;  %v632_v40 = vcombine.high %v606_v31, %v614_v32  ;;  %v699_v41 = vcombine.low %v674_v33, %v682_v34  ;;  %v700_v42 = vcombine.high %v674_v33, %v682_v34 }
 0x1f7   : > { %v655_v43 = vrot.slane %v647_v35, %v1464_v7  ;;  %v662_v44 = vrot.slane %v648_v36, %v1464_v7  ;;  %v723_v45 = vrot.slane %v715_v37, %v1464_v7  ;;  %v730_v46 = vrot.slane %v716_v38, %v1464_v7 }
 0x1f8   : > { %v639_v48 = vrot.slane %v631_v39, %v1464_v7  ;;  %v646_v47 = vrot.slane %v632_v40, %v1464_v7  ;;  %v707_v49 = vrot.slane %v699_v41, %v1464_v7  ;;  %v714_v50 = vrot.slane %v700_v42, %v1464_v7 }
 0x1fa   : > { %v663_v51 = vcombine.low %v639_v48, %v655_v43  ;;  %v664_v52 = vcombine.high %v639_v48, %v655_v43  ;;  %v665_v53 = vcombine.low %v646_v47, %v662_v44  ;;  %v666_v54 = vcombine.high %v646_v47, %v662_v44 }
 0x1fb   : > { %v731_v55 = vcombine.low %v707_v49, %v723_v45  ;;  %v732_v56 = vcombine.high %v707_v49, %v723_v45  ;;  %v733_v57 = vcombine.low %v714_v50, %v730_v46  ;;  %v734_v58 = vcombine.high %v714_v50, %v730_v46 }
 0x1fc   : > { %735 = vst.msk [vmem:[%s272_s10] sm:$0xff] %vm431_vm2, %v663_v51  ;;  %736 = vst.msk [vmem:[%s272_s10 + $0x8] sm:$0xff] %vm431_vm2, %v664_v52 }
 0x1fd   : > { %737 = vst.msk [vmem:[%s272_s10 + $0x10] sm:$0xff] %vm431_vm2, %v665_v53  ;;  %738 = vst.msk [vmem:[%s272_s10 + $0x18] sm:$0xff] %vm431_vm2, %v666_v54 }
 0x1fe   : > { %739 = vst.msk [vmem:[%s272_s10 + $0x20] sm:$0xff] %vm431_vm2, %v731_v55  ;;  %740 = vst.msk [vmem:[%s272_s10 + $0x28] sm:$0xff] %vm431_vm2, %v732_v56 }
 0x1ff   : > { %741 = vst.msk [vmem:[%s272_s10 + $0x30] sm:$0xff] %vm431_vm2, %v733_v57  ;;  %742 = vst.msk [vmem:[%s272_s10 + $0x38] sm:$0xff] %vm431_vm2, %v734_v58 }
 0x200   : > { %1135 = shalt.err (!%p1132_p7)
}
 0x201   : > { %s1136_s26 = scalar_lea.hbm %s1505_s23, 1024  ;;  %s1140_s21 = scalar_lea.hbm %s1567_s3, 3072 }
 0x202   : > { %p1137_p9 = scmp.ne.s32.totalorder %s1505_s23, %s1136_s26  ;;  %p1141_p10 = scmp.lt.u32.totalorder %s1505_s23, %s1567_s3 }
 0x203   : > { %p1142_p2 = scmp.lt.u32.totalorder %s1140_s21, %s1136_s26  ;;  %p1144_p3 = scmp.lt.u32.totalorder %s1136_s26, %s1505_s23 }
 0x204   : > { %p1138_p12 = pnand %p1137_p9, %p1599_p4 }
 0x205   : > { %p1143_p0 = por %p1142_p2, %p1141_p10 }
 0x206   : > { %p1139_p6 = pneg %p1138_p12 }
 0x207   : > { %p1145_p1 = por %p1144_p3, %p1143_p0 }
 0x209   : > { %p1146_p11 = pnand %p1145_p1, %p1139_p6 }
 0x20b   : > { %1149 = shalt.err (!%p1146_p11)
}
 0x20c   : > { %s1225_s11 = smov 128  }
 0x20d   : > { %952 = dma.vmem_to_hbm [thread:$0]  (%p1599_p4), %s1507_s19, 1024, %s1505_s23, %s744_s15, %s1225_s11, %s1225_s11, %s1217_s28  }
 0x20e PF: > { %p972_p13 = scmp.ge.s32.totalorder %s1208_s17, 2  ;;  %s773_s20 = sand.u32 1, %s1188_s12  }
 0x20f   : > { %p1600_p8 = scmp.ne.s32.totalorder %s1585_s4, 0  ;;  %s774_s10 = scalar_lea.sflag [#allocation5], %s773_s20 }
 0x211   : > { %p966_p5 = pnand %p972_p13, %p1600_p8 }
 0x213   : > { %1183 = dma.done.wait (!%p966_p5), %s774_s10, 1024  }
 0x214   : > { %1185 = vsyncadd (!%p966_p5), %s774_s10, 4294966272  ;;  %s20_s17 = sadd.s32 1, %s1208_s17   ;;  %s1601_s29 = sld [smem:[#allocation13_spill]] }
 0x215   : > { %p17_p7 = scmp.ge.s32.totalorder %s20_s17, 5   ;;  %s1602_s12 = smov %s1192_s13 }
 0x216   : > { %s1603_s13 = smov %s1196_s14  ;;  %s1604_s14 = smov %s1296_s24 }
 0x217   : > { %s1605_s15 = smov %s1204_s16  ;;  %19 = sbr.rel (!%p17_p7) target bundleno = 9 (0x9), region = 102 }
 0x21a   : > { %s1606_s16 = smov %s1601_s29 }
 0x21e   :  { %779 = vsyncpa [#allocation4], 1 }
 0x21f   :  { %781 = vsyncpa [#allocation4 + $0x1], 1 }
 0x220   :  { %782 = vsyncpa [#allocation7], 1 }
 0x221   :  { %784 = vsyncpa [#allocation7 + $0x1], 1 }
 0x222   :  { %785 = vsyncpa [#allocation5], 1 }
 0x223   :  { %787 = vsyncpa [#allocation5 + $0x1], 1 }

</bundles_post_ra>
